<compile_context>
chip_gen: v5e
topology: v5e:2x2
jax: 0.10.0
libtpu: 0.0.40
codegen_flags: <defaults>
</compile_context>

<pallas_src>
import functools
import math

import jax
import jax.numpy as jnp
import numpy as np
from jax import lax
from jax.experimental import pallas as pl
from jax.experimental.pallas import tpu as pltpu

_NEG_BIG = -1e30  # "minus infinity" fill that stays finite in f32


def _round_up(x, m):
    return (x + m - 1) // m * m


def _flash_attn_kernel(*refs, scale, causal, has_bias, block_q, block_k):
    """One (batch, head, q_tile, kv_tile) grid step.

    q_ref : (block_q, D)  k_ref/v_ref : (block_k, D)  bias_ref : (1, block_k)
    o_ref : (block_q, D)
    scratch: q_sc (block_q, D) input dtype, m_sc/l_sc (block_q, 1) f32,
             acc_sc (block_q, D) f32
    """
    if has_bias:
        q_ref, k_ref, v_ref, bias_ref, o_ref, q_sc, m_sc, l_sc, acc_sc = refs
    else:
        q_ref, k_ref, v_ref, o_ref, q_sc, m_sc, l_sc, acc_sc = refs
        bias_ref = None

    qi = pl.program_id(2)
    ki = pl.program_id(3)

    @pl.when(ki == 0)
    def _init():
        m_sc[...] = jnp.full(m_sc.shape, -jnp.inf, m_sc.dtype)
        l_sc[...] = jnp.zeros(l_sc.shape, l_sc.dtype)
        acc_sc[...] = jnp.zeros(acc_sc.shape, acc_sc.dtype)
        # Hoisted softmax scale: the q block is resident across the whole KV
        # loop (its index_map is independent of ki), so scale it exactly once.
        q_sc[...] = (q_ref[...].astype(jnp.float32) * scale).astype(q_sc.dtype)

    def _compute(apply_causal_mask):
        q = q_sc[...]                                    # native dtype into MXU
        k = k_ref[...]
        # q @ k^T without materializing a transpose: contract the D axes.
        s = lax.dot_general(q, k, (((1,), (1,)), ((), ())),
                            preferred_element_type=jnp.float32)  # (bq, bk) f32
        if has_bias:
            s = s + bias_ref[...]                        # (1, bk) additive key bias
        if apply_causal_mask:
            # Only built on diagonal-straddling tiles (see gating below).
            row = qi * block_q + lax.broadcasted_iota(
                jnp.int32, (block_q, block_k), 0)
            col = ki * block_k + lax.broadcasted_iota(
                jnp.int32, (block_q, block_k), 1)
            s = jnp.where(col <= row, s, _NEG_BIG)

        m_prev = m_sc[...]
        m_new = jnp.maximum(m_prev, jnp.max(s, axis=-1, keepdims=True))
        alpha = jnp.exp(m_prev - m_new)
        p = jnp.exp(s - m_new)
        l_sc[...] = alpha * l_sc[...] + jnp.sum(p, axis=-1, keepdims=True)
        acc_sc[...] = alpha * acc_sc[...] + jnp.dot(
            p.astype(v_ref.dtype), v_ref[...],
            preferred_element_type=jnp.float32)
        m_sc[...] = m_new

    if causal:
        q_last = qi * block_q + (block_q - 1)
        kv_first = ki * block_k
        kv_last = kv_first + (block_k - 1)
        needed = kv_first <= q_last          # tile not entirely above the diagonal
        below = kv_last <= qi * block_q      # tile entirely on/below the diagonal
        # Unmasked fast path for fully-below tiles, masked path only on the
        # diagonal-straddling tiles; above-diagonal tiles are skipped entirely.
        pl.when(jnp.logical_and(needed, below))(lambda: _compute(False))
        pl.when(jnp.logical_and(needed, jnp.logical_not(below)))(
            lambda: _compute(True))
    else:
        _compute(False)

    @pl.when(ki == pl.num_programs(3) - 1)
    def _finalize():
        # EUP approximate reciprocal: ~1e-3 rel error, acceptable for inference.
        inv_l = pl.reciprocal(l_sc[...], approx=True)
        o_ref[...] = (acc_sc[...] * inv_l).astype(o_ref.dtype)


def xformers_self_attention(qkv, causal=False, key_padding_mask=None,
                            softmax_scale=None, block_q=None, block_k=None):
    """qkv: (B, S, 3, H, D) -> (B, S, H, D)."""
    B, S, three, H, D = qkv.shape
    assert three == 3
    scale = float(softmax_scale) if softmax_scale is not None else 1.0 / math.sqrt(D)
    causal = bool(causal)

    # Tile selection: large tiles amortize the ~0.35 us per-grid-step overhead
    # and cut K/V HBM re-reads (K/V are re-fetched once per q tile).  VMEM use
    # is O(tile^2 + tile*D), independent of S, still only a few MiB at 512.
    if block_q is None:
        if S >= 512:
            block_q = 512
        elif S >= 256:
            block_q = 256
        elif S >= 128:
            block_q = 128
        else:
            block_q = _round_up(S, 8)
    if block_k is None:
        block_k = min(block_q, 512)
    lcm = block_q * block_k // math.gcd(block_q, block_k)
    S_pad = _round_up(S, lcm)

    qkv_p = qkv
    if S_pad != S:
        qkv_p = jnp.pad(qkv, ((0, 0), (0, S_pad - S), (0, 0), (0, 0), (0, 0)))

    # One-time de-interleave: (B, S, 3, H, D) -> (3, B, H, S, D).  Every
    # subsequent q/k/v tile fetch is then a contiguous (block, D) slab.
    qkv_t = jnp.transpose(qkv_p, (2, 0, 3, 1, 4))

    # Additive key bias (B, S_pad): 0 keep / -10000 masked-out (xformers
    # semantics); sequence-padding keys get -1e30 so they never contribute.
    # Compiled out entirely when there is no mask and no padding.
    has_bias = (key_padding_mask is not None) or (S_pad != S)
    bias = None
    if has_bias:
        if key_padding_mask is not None:
            keep = key_padding_mask
            if S_pad != S:
                keep = jnp.pad(keep, ((0, 0), (0, S_pad - S)),
                               constant_values=False)
            bias = jnp.where(keep, 0.0, -10000.0).astype(jnp.float32)
        else:
            bias = jnp.zeros((B, S_pad), dtype=jnp.float32)
        if S_pad != S:
            bias = jnp.where((jnp.arange(S_pad) < S)[None, :], bias, _NEG_BIG)

    grid = (B, H, S_pad // block_q, S_pad // block_k)

    # Causal DMA dedupe: skipped KV tiles return the same block index as the
    # last needed tile so the pipeline elides the copy.
    if causal:
        def kv_block(qi, ki):
            return jnp.minimum(ki, (qi * block_q + block_q - 1) // block_k)
    else:
        def kv_block(qi, ki):
            return ki

    q_spec = pl.BlockSpec((None, None, None, block_q, D),
                          lambda b, h, qi, ki: (0, b, h, qi, 0))
    k_spec = pl.BlockSpec((None, None, None, block_k, D),
                          lambda b, h, qi, ki: (1, b, h, kv_block(qi, ki), 0))
    v_spec = pl.BlockSpec((None, None, None, block_k, D),
                          lambda b, h, qi, ki: (2, b, h, kv_block(qi, ki), 0))
    out_spec = pl.BlockSpec((None, None, block_q, D),
                            lambda b, h, qi, ki: (b, h, qi, 0))

    in_specs = [q_spec, k_spec, v_spec]
    operands = [qkv_t, qkv_t, qkv_t]
    if has_bias:
        in_specs.append(pl.BlockSpec((1, block_k),
                                     lambda b, h, qi, ki: (b, kv_block(qi, ki))))
        operands.append(bias)

    # VMEM budget derived from the actual block footprint (+headroom), capped
    # at 64 MiB so the same number is valid on v7x.
    itemsize = jnp.dtype(qkv.dtype).itemsize
    est = (2 * block_q * D              # q (double-buffered)
           + 4 * block_k * D            # k + v (double-buffered)
           + 2 * block_q * D            # out (double-buffered)
           + block_q * D) * itemsize    # scaled-q scratch
    est += block_q * (D + 2) * 4        # f32 acc + running max/sum
    est += 2 * block_q * block_k * 4    # score / prob intermediates (f32)
    if has_bias:
        est += 2 * block_k * 4
    vmem_limit = int(min(max(4 * est, 32 * 1024 * 1024), 64 * 1024 * 1024))

    kernel = functools.partial(_flash_attn_kernel, scale=scale, causal=causal,
                               has_bias=has_bias, block_q=block_q,
                               block_k=block_k)

    out = pl.pallas_call(
        kernel,
        out_shape=jax.ShapeDtypeStruct((B, H, S_pad, D), qkv.dtype),
        grid_spec=pltpu.PrefetchScalarGridSpec(
            num_scalar_prefetch=0,
            grid=grid,
            in_specs=in_specs,
            out_specs=out_spec,
            scratch_shapes=[
                pltpu.VMEM((block_q, D), qkv.dtype),     # scaled q (per q tile)
                pltpu.VMEM((block_q, 1), jnp.float32),   # running max
                pltpu.VMEM((block_q, 1), jnp.float32),   # running sum
                pltpu.VMEM((block_q, D), jnp.float32),   # output accumulator
            ]),
        compiler_params=pltpu.CompilerParams(
            dimension_semantics=("parallel", "parallel", "parallel", "arbitrary"),
            vmem_limit_bytes=vmem_limit),
    )(*operands)

    out = jnp.transpose(out, (0, 2, 1, 3))   # (B, H, S, D) -> (B, S, H, D)
    if S_pad != S:
        out = out[:, :S]
    return out


def _reference(qkv, causal=False, key_padding_mask=None, softmax_scale=None):
    """Pure-JAX reference mirroring xformer_memory_efficient_attention."""
    B, S, _, H, D = qkv.shape
    scale = softmax_scale if softmax_scale is not None else 1.0 / math.sqrt(D)
    q = qkv[:, :, 0].astype(jnp.float32)
    k = qkv[:, :, 1].astype(jnp.float32)
    v = qkv[:, :, 2].astype(jnp.float32)
    s = jnp.einsum("bqhd,bkhd->bhqk", q, k) * scale
    if key_padding_mask is not None:
        s = s + jnp.where(key_padding_mask, 0.0, -10000.0)[:, None, None, :]
    if causal:
        row = jnp.arange(S)[:, None]
        col = jnp.arange(S)[None, :]
        s = jnp.where(col <= row, s, _NEG_BIG)
    p = jax.nn.softmax(s, axis=-1)
    return jnp.einsum("bhqk,bkhd->bqhd", p, v).astype(qkv.dtype)


if __name__ == "__main__":
    # XFormersSelfAttention(causal=False, softmax_scale=None, attention_dropout=0.0)
    B, S, H, D = 2, 8, 2, 32
    key = jax.random.PRNGKey(0)
    qkv = jax.random.normal(key, (B, S, 3, H, D), dtype=jnp.float32)

    # Tolerance covers the EUP approximate reciprocal used for normalization.
    TOL = dict(rtol=5e-3, atol=5e-3)

    # 1) default module call: causal=False, no padding mask (bias compiled out).
    out = xformers_self_attention(qkv, causal=False, key_padding_mask=None)
    out = jax.block_until_ready(out)
    ref = _reference(qkv, causal=False)
    assert out.shape == (B, S, H, D)
    np.testing.assert_allclose(np.asarray(out), np.asarray(ref), **TOL)

    # 2) causal + key_padding_mask on the same small shape.
    kpm = jnp.arange(S)[None, :] < jnp.array([[S], [S - 3]])   # (B, S) bools
    out2 = jax.block_until_ready(
        xformers_self_attention(qkv, causal=True, key_padding_mask=kpm))
    ref2 = _reference(qkv, causal=True, key_padding_mask=kpm)
    np.testing.assert_allclose(np.asarray(out2), np.asarray(ref2), **TOL)

    # 3) multi-tile flash path (4 q-tiles x 4 kv-tiles) with causal skip,
    #    causal DMA-dedupe index clamping, diagonal-only masking, and padding
    #    mask.
    S3 = 32
    qkv3 = jax.random.normal(jax.random.PRNGKey(1), (B, S3, 3, H, D), jnp.float32)
    kpm3 = jnp.arange(S3)[None, :] < jnp.array([[S3], [S3 - 5]])
    out3 = jax.block_until_ready(
        xformers_self_attention(qkv3, causal=True, key_padding_mask=kpm3,
                                block_q=8, block_k=8))
    ref3 = _reference(qkv3, causal=True, key_padding_mask=kpm3)
    np.testing.assert_allclose(np.asarray(out3), np.asarray(ref3), **TOL)

    # 4) sequence length that is not a tile multiple (exercises padding path;
    #    bias is auto-enabled to neutralize padded keys).
    S4 = 12
    qkv4 = jax.random.normal(jax.random.PRNGKey(2), (1, S4, 3, H, D), jnp.float32)
    out4 = jax.block_until_ready(
        xformers_self_attention(qkv4, causal=False, block_q=8, block_k=8))
    ref4 = _reference(qkv4, causal=False)
    assert out4.shape == (1, S4, H, D)
    np.testing.assert_allclose(np.asarray(out4), np.asarray(ref4), **TOL)

    print("KERNEL_OK")
</pallas_src>

<mosaic_0001>
module attributes {stable_mosaic.version = 11 : i64} {
  func.func @_flash_attn_kernel(%arg0: i32, %arg1: i32, %arg2: i32, %arg3: i32, %arg4: memref<1x1x1x8x32xf32, #tpu.memory_space<vmem>>, %arg5: memref<1x1x1x8x32xf32, #tpu.memory_space<vmem>>, %arg6: memref<1x1x1x8x32xf32, #tpu.memory_space<vmem>>, %arg7: memref<1x1x8x32xf32, #tpu.memory_space<vmem>>, %arg8: memref<8x32xf32, #tpu.memory_space<vmem>>, %arg9: memref<8x1xf32, #tpu.memory_space<vmem>>, %arg10: memref<8x1xf32, #tpu.memory_space<vmem>>, %arg11: memref<8x32xf32, #tpu.memory_space<vmem>>) attributes {dimension_semantics = [#tpu.dimension_semantics<parallel>, #tpu.dimension_semantics<parallel>, #tpu.dimension_semantics<parallel>, #tpu.dimension_semantics<arbitrary>], iteration_bounds = array<i64: 2, 2, 1, 1>, scalar_prefetch = 0 : i64, scratch_operands = 4 : i64, tpu.core_type = #tpu.core_type<tc>, window_params = [{transform_indices = @transform_0, window_bounds = array<i64: 1, 1, 1, 8, 32>}, {transform_indices = @transform_1, window_bounds = array<i64: 1, 1, 1, 8, 32>}, {transform_indices = @transform_2, window_bounds = array<i64: 1, 1, 1, 8, 32>}, {transform_indices = @transform_3, window_bounds = array<i64: 1, 1, 8, 32>}]} {
    %c0_i32 = arith.constant 0 : i32
    %0 = arith.cmpi eq, %arg3, %c0_i32 : i32
    %1 = arith.extui %0 : i1 to i32
    %c0_i32_0 = arith.constant 0 : i32
    %2 = arith.cmpi ne, %1, %c0_i32_0 : i32
    scf.if %2 {
      %cst_29 = arith.constant 0xFF800000 : f32
      %34 = vector.broadcast %cst_29 : f32 to vector<8x1xf32>
      %c0_30 = arith.constant 0 : index
      %c0_31 = arith.constant 0 : index
      %35 = vector.load %arg9[%c0_30, %c0_31] : memref<8x1xf32, #tpu.memory_space<vmem>>, vector<8x1xf32>
      tpu.vector_store %arg9[%c0_30, %c0_31], %34 {strides = array<i32>} : memref<8x1xf32, #tpu.memory_space<vmem>>, vector<8x1xf32>,
      %cst_32 = arith.constant 0.000000e+00 : f32
      %36 = vector.broadcast %cst_32 : f32 to vector<8x1xf32>
      %c0_33 = arith.constant 0 : index
      %c0_34 = arith.constant 0 : index
      %37 = vector.load %arg10[%c0_33, %c0_34] : memref<8x1xf32, #tpu.memory_space<vmem>>, vector<8x1xf32>
      tpu.vector_store %arg10[%c0_33, %c0_34], %36 {strides = array<i32>} : memref<8x1xf32, #tpu.memory_space<vmem>>, vector<8x1xf32>,
      %cst_35 = arith.constant 0.000000e+00 : f32
      %38 = vector.broadcast %cst_35 : f32 to vector<8x32xf32>
      %c0_36 = arith.constant 0 : index
      %c0_37 = arith.constant 0 : index
      %39 = vector.load %arg11[%c0_36, %c0_37] : memref<8x32xf32, #tpu.memory_space<vmem>>, vector<8x32xf32>
      tpu.vector_store %arg11[%c0_36, %c0_37], %38 {strides = array<i32>} : memref<8x32xf32, #tpu.memory_space<vmem>>, vector<8x32xf32>,
      %c0_38 = arith.constant 0 : index
      %c0_39 = arith.constant 0 : index
      %c0_40 = arith.constant 0 : index
      %c0_41 = arith.constant 0 : index
      %c0_42 = arith.constant 0 : index
      %40 = vector.load %arg4[%c0_38, %c0_39, %c0_40, %c0_41, %c0_42] : memref<1x1x1x8x32xf32, #tpu.memory_space<vmem>>, vector<1x1x1x8x32xf32>
      %41 = vector.shape_cast %40 : vector<1x1x1x8x32xf32> to vector<8x32xf32>
      %cst_43 = arith.constant 0.176776692 : f32
      %42 = vector.broadcast %cst_43 : f32 to vector<8x32xf32>
      %43 = arith.mulf %41, %42 : vector<8x32xf32>
      %c0_44 = arith.constant 0 : index
      %c0_45 = arith.constant 0 : index
      %44 = vector.load %arg8[%c0_44, %c0_45] : memref<8x32xf32, #tpu.memory_space<vmem>>, vector<8x32xf32>
      tpu.vector_store %arg8[%c0_44, %c0_45], %43 {strides = array<i32>} : memref<8x32xf32, #tpu.memory_space<vmem>>, vector<8x32xf32>,
    } else {
    }
    %c0 = arith.constant 0 : index
    %c0_1 = arith.constant 0 : index
    %3 = vector.load %arg8[%c0, %c0_1] : memref<8x32xf32, #tpu.memory_space<vmem>>, vector<8x32xf32>
    %c0_2 = arith.constant 0 : index
    %c0_3 = arith.constant 0 : index
    %c0_4 = arith.constant 0 : index
    %c0_5 = arith.constant 0 : index
    %c0_6 = arith.constant 0 : index
    %4 = vector.load %arg5[%c0_2, %c0_3, %c0_4, %c0_5, %c0_6] : memref<1x1x1x8x32xf32, #tpu.memory_space<vmem>>, vector<1x1x1x8x32xf32>
    %5 = vector.shape_cast %4 : vector<1x1x1x8x32xf32> to vector<8x32xf32>
    %cst = arith.constant dense<0.000000e+00> : vector<8x8xf32>
    %6 = tpu.matmul %3, %5, %cst {dimension_numbers = #tpu.dot_dimension_numbers<[1], [1], [0], [0], [0, 0, 1, 0], [], []>} : vector<8x32xf32>, vector<8x32xf32>, vector<8x8xf32> -> vector<8x8xf32>
    %c0_7 = arith.constant 0 : index
    %c0_8 = arith.constant 0 : index
    %7 = vector.load %arg9[%c0_7, %c0_8] : memref<8x1xf32, #tpu.memory_space<vmem>>, vector<8x1xf32>
    %cst_9 = arith.constant dense<0xFF800000> : vector<8xf32>
    %8 = vector.multi_reduction <maximumf>, %6, %cst_9 [1] : vector<8x8xf32> to vector<8xf32>
    %9 = vector.shape_cast %8 : vector<8xf32> to vector<8x1xf32>
    %10 = arith.maximumf %7, %9 : vector<8x1xf32>
    %11 = arith.subf %7, %10 : vector<8x1xf32>
    %12 = math.exp %11 : vector<8x1xf32>
    %13 = vector.broadcast %10 : vector<8x1xf32> to vector<8x8xf32>
    %14 = arith.subf %6, %13 : vector<8x8xf32>
    %15 = math.exp %14 : vector<8x8xf32>
    %c0_10 = arith.constant 0 : index
    %c0_11 = arith.constant 0 : index
    %16 = vector.load %arg10[%c0_10, %c0_11] : memref<8x1xf32, #tpu.memory_space<vmem>>, vector<8x1xf32>
    %17 = arith.mulf %12, %16 : vector<8x1xf32>
    %cst_12 = arith.constant dense<0.000000e+00> : vector<8xf32>
    %18 = vector.multi_reduction <add>, %15, %cst_12 [1] : vector<8x8xf32> to vector<8xf32>
    %19 = vector.shape_cast %18 : vector<8xf32> to vector<8x1xf32>
    %20 = arith.addf %17, %19 : vector<8x1xf32>
    %c0_13 = arith.constant 0 : index
    %c0_14 = arith.constant 0 : index
    %21 = vector.load %arg10[%c0_13, %c0_14] : memref<8x1xf32, #tpu.memory_space<vmem>>, vector<8x1xf32>
    tpu.vector_store %arg10[%c0_13, %c0_14], %20 {strides = array<i32>} : memref<8x1xf32, #tpu.memory_space<vmem>>, vector<8x1xf32>,
    %c0_15 = arith.constant 0 : index
    %c0_16 = arith.constant 0 : index
    %22 = vector.load %arg11[%c0_15, %c0_16] : memref<8x32xf32, #tpu.memory_space<vmem>>, vector<8x32xf32>
    %23 = vector.broadcast %12 : vector<8x1xf32> to vector<8x32xf32>
    %24 = arith.mulf %23, %22 : vector<8x32xf32>
    %c0_17 = arith.constant 0 : index
    %c0_18 = arith.constant 0 : index
    %c0_19 = arith.constant 0 : index
    %c0_20 = arith.constant 0 : index
    %c0_21 = arith.constant 0 : index
    %25 = vector.load %arg6[%c0_17, %c0_18, %c0_19, %c0_20, %c0_21] : memref<1x1x1x8x32xf32, #tpu.memory_space<vmem>>, vector<1x1x1x8x32xf32>
    %26 = vector.shape_cast %25 : vector<1x1x1x8x32xf32> to vector<8x32xf32>
    %cst_22 = arith.constant dense<0.000000e+00> : vector<8x32xf32>
    %27 = tpu.matmul %15, %26, %cst_22 {dimension_numbers = #tpu.dot_dimension_numbers<[1], [0], [0], [1], [0, 0, 1, 1], [], []>} : vector<8x8xf32>, vector<8x32xf32>, vector<8x32xf32> -> vector<8x32xf32>
    %28 = arith.addf %24, %27 : vector<8x32xf32>
    %c0_23 = arith.constant 0 : index
    %c0_24 = arith.constant 0 : index
    %29 = vector.load %arg11[%c0_23, %c0_24] : memref<8x32xf32, #tpu.memory_space<vmem>>, vector<8x32xf32>
    tpu.vector_store %arg11[%c0_23, %c0_24], %28 {strides = array<i32>} : memref<8x32xf32, #tpu.memory_space<vmem>>, vector<8x32xf32>,
    %c0_25 = arith.constant 0 : index
    %c0_26 = arith.constant 0 : index
    %30 = vector.load %arg9[%c0_25, %c0_26] : memref<8x1xf32, #tpu.memory_space<vmem>>, vector<8x1xf32>
    tpu.vector_store %arg9[%c0_25, %c0_26], %10 {strides = array<i32>} : memref<8x1xf32, #tpu.memory_space<vmem>>, vector<8x1xf32>,
    %c0_i32_27 = arith.constant 0 : i32
    %31 = arith.cmpi eq, %arg3, %c0_i32_27 : i32
    %32 = arith.extui %31 : i1 to i32
    %c0_i32_28 = arith.constant 0 : i32
    %33 = arith.cmpi ne, %32, %c0_i32_28 : i32
    scf.if %33 {
      %c0_29 = arith.constant 0 : index
      %c0_30 = arith.constant 0 : index
      %34 = vector.load %arg10[%c0_29, %c0_30] : memref<8x1xf32, #tpu.memory_space<vmem>>, vector<8x1xf32>
      %35 = tpu.reciprocal %34 {approx = true} : vector<8x1xf32> -> vector<8x1xf32>
      %c0_31 = arith.constant 0 : index
      %c0_32 = arith.constant 0 : index
      %36 = vector.load %arg11[%c0_31, %c0_32] : memref<8x32xf32, #tpu.memory_space<vmem>>, vector<8x32xf32>
      %37 = vector.broadcast %35 : vector<8x1xf32> to vector<8x32xf32>
      %38 = arith.mulf %36, %37 : vector<8x32xf32>
      %c0_33 = arith.constant 0 : index
      %c0_34 = arith.constant 0 : index
      %c0_35 = arith.constant 0 : index
      %c0_36 = arith.constant 0 : index
      %39 = vector.load %arg7[%c0_33, %c0_34, %c0_35, %c0_36] : memref<1x1x8x32xf32, #tpu.memory_space<vmem>>, vector<1x1x8x32xf32>
      %40 = vector.shape_cast %39 : vector<1x1x8x32xf32> to vector<8x32xf32>
      %41 = vector.shape_cast %38 : vector<8x32xf32> to vector<1x1x8x32xf32>
      tpu.vector_store %arg7[%c0_33, %c0_34, %c0_35, %c0_36], %41 {strides = array<i32>} : memref<1x1x8x32xf32, #tpu.memory_space<vmem>>, vector<1x1x8x32xf32>,
    } else {
    }
    return
  }
  func.func @transform_0(%arg0: i32, %arg1: i32, %arg2: i32, %arg3: i32) -> (i32, i32, i32, i32, i32) {
    %c0_i32 = arith.constant 0 : i32
    %c0_i32_0 = arith.constant 0 : i32
    %c0_i32_1 = arith.constant 0 : i32
    return %c0_i32, %arg0, %arg1, %arg2, %c0_i32_0 : i32, i32, i32, i32, i32
  }
  func.func @transform_1(%arg0: i32, %arg1: i32, %arg2: i32, %arg3: i32) -> (i32, i32, i32, i32, i32) {
    %c1_i32 = arith.constant 1 : i32
    %c0_i32 = arith.constant 0 : i32
    %c0_i32_0 = arith.constant 0 : i32
    return %c1_i32, %arg0, %arg1, %arg3, %c0_i32 : i32, i32, i32, i32, i32
  }
  func.func @transform_2(%arg0: i32, %arg1: i32, %arg2: i32, %arg3: i32) -> (i32, i32, i32, i32, i32) {
    %c2_i32 = arith.constant 2 : i32
    %c0_i32 = arith.constant 0 : i32
    %c0_i32_0 = arith.constant 0 : i32
    return %c2_i32, %arg0, %arg1, %arg3, %c0_i32 : i32, i32, i32, i32, i32
  }
  func.func @transform_3(%arg0: i32, %arg1: i32, %arg2: i32, %arg3: i32) -> (i32, i32, i32, i32) {
    %c0_i32 = arith.constant 0 : i32
    %c0_i32_0 = arith.constant 0 : i32
    return %arg0, %arg1, %arg2, %c0_i32 : i32, i32, i32, i32
  }
}

</mosaic_0001>

<bundles_post_ra>
// kernel: tpu_custom_call.1
= control target key start
LH: loop header
LB: loop body
LE: loop exit
PB: predicated region body
PF: predicated region fallthrough
CT: control target
= control target key end

     0   :  { %s1128_s0 = inlined_call_operand.hbm [shape: f32[3,2,2,8,32], index: 0, kind: input, shape index: {}]   ;;  %s1129_s1 = inlined_call_operand.hbm [shape: f32[3,2,2,8,32], index: 1, kind: input, shape index: {}]   ;;  %s1130_s2 = inlined_call_operand.hbm [shape: f32[3,2,2,8,32], index: 2, kind: input, shape index: {}]   ;;  %s1131_s3 = inlined_call_operand.hbm [shape: f32[2,2,8,32], index: 3, kind: output, shape index: {}]  }
   0x1   :  { %1138 = sst [smem:[#allocation23_spill]] %s1129_s1 }
   0x2   :  { %8 = vsyncpa [#allocation7], 0 }
   0x3   :  { %10 = vsyncpa [#allocation7 + $0x1], 0 }
   0x4   :  { %11 = vsyncpa [#allocation10], 0 }
   0x5   :  { %13 = vsyncpa [#allocation10 + $0x1], 0 }
   0x6   :  { %14 = vsyncpa [#allocation8], 0 }
   0x7   :  { %16 = vsyncpa [#allocation8 + $0x1], 0  ;;  %s935_s12 = smov 0   ;;  %s937_s13 = smov 0  }
   0x8   :  { %s939_s14 = smov 0   ;;  %s941_s15 = smov 0  }
   0x9   :  { %s943_s16 = smov 0   ;;  %s945_s17 = smov 0  }
   0xa   :  { %s947_s18 = smov 0   ;;  %s949_s19 = smov 0  }
   0xb LB: > { %1139 = sst [smem:[#allocation16_spill]] %s890_s14  ;;  %s976_s20 = sadd.s32 4294967295, %s910_s19   ;;  %s910_s19 = sphi %s949_s19, %s22_s19   ;;  %s906_s18 = sphi %s947_s18, %s1159_s18   ;;  %s902_s17 = sphi %s945_s17, %s1163_s17   ;;  %s898_s16 = sphi %s943_s16, %s1157_s16   ;;  %s894_s15 = sphi %s941_s15, %s1156_s15   ;;  %s890_s14 = sphi %s939_s14, %s1162_s14   ;;  %s886_s13 = sphi %s937_s13, %s1161_s13   ;;  %s882_s12 = sphi %s935_s12, %s1160_s12  }
   0xc   : > { %1140 = sst [smem:[#allocation17_spill]] %s902_s17  ;;  %s593_s21 = sadd.s32 4294967294, %s910_s19  }
   0xd   : > { %1141 = sst [smem:[#allocation18_spill]] %s906_s18  ;;  %s44_s22 = sadd.s32 1, %s902_s17 }
   0xe   : > { %s48_s23 = sadd.s32 1, %s906_s18  ;;  %p46_p0 = scmp.ge.s32.totalorder %s44_s22, 2 }
   0xf   : > { %s59_s24 = sadd.s32 1, %s890_s14  ;;  %p66_p1 = scmp.ne.s32.totalorder %s890_s14, %s886_s13 }
  0x10   : > { %p67_p2 = scmp.eq.s32.totalorder %s910_s19, 0  ;;  %s1165_s22 = smov (%p46_p0, %s44_s22), 0 }
  0x11   : > { %1142 = sst [smem:[#allocation19_spill]] %s1165_s22  ;;  %s1167_s23 = smov (!%p46_p0, %s48_s23), %s906_s18 }
  0x12   : > { %s53_s25 = ssub.s32 %s902_s17, %s1165_s22  ;;  %p990_p3 = por %p67_p2, %p66_p1 }
  0x13   : > { %p50_p4 = scmp.ge.s32.totalorder %s1167_s23, 2  ;;  %p72_p5 = scmp.ne.s32.totalorder %s886_s13, %s882_s12 }
  0x14   : > { %p73_p6 = scmp.eq.s32.totalorder %s976_s20, 0  ;;  %p160_p7 = scmp.eq.s32.totalorder %s976_s20, 3 }
  0x15   : > { %s1169_s23 = smov (%p50_p4, %s1167_s23), 0  ;;  %p166_p10 = scmp.eq.s32.totalorder %s593_s21, 3 }
  0x16   : > { %1144 = sst [smem:[#allocation20_spill]] %s1169_s23  ;;  %p1000_p8 = por %p73_p6, %p72_p5 }
  0x17   : > { %p1004_p9 = por %p160_p7, %p66_p1  ;;  %s52_s29 = ssub.s32 %s906_s18, %s1169_s23 }
  0x18   : > { %s54_s30 = sor.u32 %s53_s25, %s52_s29  ;;  %p1010_p12 = por %p166_p10, %p72_p5 }
  0x19   : > { %p57_p11 = scmp.eq.s32.totalorder %s54_s30, 0  ;;  %p640_p13 = scmp.lt.s32.totalorder %s910_s19, 4 }
  0x1a   : > { %s1147_s4 = scalar_select %p1010_p12, 1, 0 }
  0x1b   : > { %s186_s5 = sand.u32 1, %s890_s14   ;;  %s597_s8 = sshll.u32 %s906_s18, 1 }
  0x1c   : > { %1148 = sst [smem:[#allocation21_spill]] %s1147_s4  ;;  %s596_s7 = sshll.u32 %s186_s5, 3 }
  0x1d   : > { %s1017_s6 = scalar_select %p57_p11, %s890_s14, %s59_s24  }
  0x1e   : > { %s195_s9 = sadd.s32 %s902_s17, %s597_s8  ;;  %p1023_p0 = pnand %p640_p13, %p990_p3 }
  0x1f   : > { %1149 = sst [smem:[#allocation22_spill]] %s1017_s6  ;;  %s598_s11 = sshll.u32 %s195_s9, 3 }
  0x20   : > { %s208_s21 = sand.u32 1, %s910_s19   ;;  %s1151_s1 = sld [smem:[#allocation23_spill]] }
  0x21   : > { %s212_s22 = scalar_lea.vmem [#allocation9], %s596_s7  ;;  %p605_p1 = scmp.ge.s32.totalorder %s910_s19, 1 }
  0x22   : > { %s224_s24 = sshll.u32 %s212_s22, 4  ;;  %s209_s26 = scalar_lea.sflag [#allocation10], %s208_s21  ;;  %s225_s24 = int_to_ptr.vmem [resolvable:$true] %s224_s24 }
  0x23   : > { %p252_p2 = scmp.lt.s32.totalorder %s910_s19, 5  ;;  %s197_s25 = scalar_lea.hbm %s1128_s0, %s598_s11 }
  0x24   : > { %s190_s29 = scalar_lea.vmem [#allocation6], %s596_s7 }
  0x25   : > { %p1035_p3 = pnand %p605_p1, %p252_p2  ;;  %s201_s22 = sshll.u32 %s190_s29, 4  ;;  %s202_s22 = int_to_ptr.vmem [resolvable:$true] %s201_s22 }
  0x26   : > { %s490_s30 = scalar_lea.hbm %s1151_s1, %s598_s11  ;;  %s235_s1 = scalar_lea.vmem [#allocation11], %s596_s7 }
  0x27   : > { %s491_s23 = scalar_lea.hbm %s490_s30, 32  ;;  %s199_s30 = sshll.u32 %s197_s25, 4  ;;  %s200_s30 = int_to_ptr.hbm [resolvable:$true] %s199_s30 }
  0x28   : > { %s222_s6 = sshll.u32 %s491_s23, 4  ;;  %s187_s23 = scalar_lea.sflag [#allocation7], %s186_s5  ;;  %s223_s6 = int_to_ptr.hbm [resolvable:$true] %s222_s6 }
  0x29   : > { %632 = dma.hbm_to_vmem [thread:$0]  (!%p1023_p0), %s223_s6, 128, %s225_s24, %s209_s26  }
  0x2a   : > { %629 = dma.hbm_to_vmem [thread:$0]  (!%p1023_p0), %s200_s30, 128, %s202_s22, %s187_s23  }
  0x2b   : > { %s499_s24 = scalar_lea.hbm %s1130_s2, %s598_s11  ;;  %s247_s17 = sshll.u32 %s235_s1, 4  ;;  %s248_s17 = int_to_ptr.vmem [resolvable:$true] %s247_s17 }
  0x2c   : > { %s500_s14 = scalar_lea.hbm %s499_s24, 64  ;;  %256 = sbr.rel (%p1035_p3) target bundleno = 665 (0x299), region = 32 }
  0x2d   : > { %s245_s4 = sshll.u32 %s500_s14, 4  ;;  %s1052_s18 = sand.u32 (!%p1035_p3), 1, %s886_s13   ;;  %s246_s4 = int_to_ptr.hbm [resolvable:$true] %s245_s4 }
  0x2e   : > { %635 = dma.hbm_to_vmem [thread:$0]  (!%p1023_p0), %s246_s4, 128, %s248_s17, %s209_s26  }
  0x2f   : > { %s1055_s5 = sshll.u32 (!%p1035_p3), %s1052_s18, 3  ;;  %s259_s7 = scalar_lea.sflag (!%p1035_p3), [#allocation7], %s1052_s18 }
  0x30   : > { %s262_s1 = scalar_lea.vmem (!%p1035_p3), [#allocation6], %s1055_s5 }
  0x31   : > { %869 = dma.done.wait (%p1000_p8), %s259_s7, 128  }
  0x32   : > { %871 = vsyncadd (%p1000_p8), %s259_s7, 4294967168  ;;  %s268_s14 = sand.u32 1, %s976_s20   ;;  %s272_s4 = scalar_lea.vmem [#allocation9], %s1055_s5 }
  0x33   : > { %s269_s17 = scalar_lea.sflag [#allocation10], %s268_s14 }
  0x34   : > { %873 = dma.done.wait (%p1000_p8), %s269_s17, 256  }
  0x35   : > { %875 = vsyncadd (%p1000_p8), %s269_s17, 4294967040  ;;  %vm323_vm0 = vcmask 261120   ;;  %v325_v0 = vld [vmem:[%s262_s1] sm:$0xff]  ;;  %v329_v1 = vld [vmem:[%s272_s4] sm:$0xff]  ;;  %vm320_vm1 = vcmask 7168   ;;  %v912_v4 = vmov -inf  }
  0x36   : > { %v326_v2 = vmul.f32 0.17677669, %v325_v0  ;;  %610 = vmatpush.xpose.msk.msra.mxu0 %vm323_vm0, %v329_v1  ;;  %321 = vst.msk [vmem:[#allocation3] sm:$0xff] %vm320_vm1, %v912_v4  ;;  %vm358_vm2 = vcmask 64512   ;;  %v913_v7 = vmov 0   ;;  %v914_v8 = vmov 0.0  }
  0x37   : > { %709 = vset.pattern.permute.xlu0 %v913_v7  ;;  %710 = vset.pattern.permute.xlu1 %v913_v7  ;;  %322 = vst.msk [vmem:[#allocation4] sm:$0xff] %vm320_vm1, %v914_v8  ;;  %s282_s20 = scalar_lea.vmem [#allocation11], %s1055_s5  ;;  %s614_s27 = sshll.u32 %s898_s16, 1 }
  0x38   : > { %327 = vst.msk [vmem:[#allocation2] sm:$0xff] %vm323_vm0, %v326_v2  ;;  %711 = vset.pattern.permute.xlu2 %v913_v7  ;;  %v389_v13 = vld [vmem:[%s282_s20] sm:$0xff]  ;;  %s441_s10 = sadd.s32 %s894_s15, %s614_s27  ;;  %s315_s25 = scalar_lea.vmem [#allocation12], %s1055_s5 }
  0x39   : > { %324 = vst.msk [vmem:[#allocation5] sm:$0xff] %vm323_vm0, %v914_v8  ;;  %408 = vmatpush.msra.mxu1 %v389_v13  ;;  %s615_s11 = sshll.u32 %s441_s10, 3  ;;  %s445_s29 = sshll.u32 %s315_s25, 4  ;;  %s446_s29 = int_to_ptr.vmem [resolvable:$true] %s445_s29 }
  0x3a   : > { %s443_s9 = scalar_lea.hbm %s1131_s3, %s615_s11  ;;  %s430_s30 = scalar_lea.sflag [#allocation8], %s1052_s18 }
  0x3b   : > { %s447_s22 = sshll.u32 %s443_s9, 4  ;;  %s828_s6 = scalar_lea.hbm %s1131_s3, 32  ;;  %s448_s22 = int_to_ptr.hbm [resolvable:$true] %s447_s22 }
  0x3c   : > { %s822_s23 = sshra.s32 %s448_s22, 4  ;;  %s823_s23 = int_to_ptr.hbm [resolvable:$true] %s822_s23 }
  0x3d   : > { %v357_v9 = vld [vmem:[#allocation3] sm:$0xff]  ;;  %s824_s15 = scalar_lea.hbm %s823_s23, 8  ;;  %p829_p7 = scmp.lt.s32.totalorder %s823_s23, %s1131_s3 }
  0x3e   : > { %v374_v21 = vld [vmem:[#allocation4] sm:$0xff]  ;;  %p825_p4 = scmp.ne.s32.totalorder %s823_s23, %s824_s15  ;;  %p830_p8 = scmp.lt.s32.totalorder %s828_s6, %s824_s15 }
  0x3f   : > { %v328_v3 = vld [vmem:[#allocation2] sm:$0xff] }
  0x40   : > { %611 = vmatmul.msk.f32.vlgmr.msra.gmra.mxu0 %vm323_vm0, %v328_v3  ;;  %v382_v27 = vld [vmem:[#allocation5] sm:$0xff]  ;;  %p826_p5 = pnand %p825_p4, %p1004_p9  ;;  %p831_p10 = por %p830_p8, %p829_p7 }
  0x42   : > { %p827_p6 = pneg %p826_p5 }
  0x44   : > { %p832_p11 = pnand %p831_p10, %p827_p6 }
  0xbd   : > { %v354_v5 = vpop.f32.mrf.mxu0 }
  0xbe   : > { %v359_v6 = vsel %vm358_vm2, %v354_v5, -inf }
  0xbf   : > { %360 = vmax.xlane.f32.xlu0 %v359_v6 }
 0x132   : > { %v361_v10 = vpop.xlane.xlu0 %360 }
 0x133   : > { %v362_v11 = vmax.f32 %v357_v9, %v361_v10 }
 0x135   : > { %v363_v12 = vsub.f32 %v357_v9, %v362_v11  ;;  %415 = vst.msk [vmem:[#allocation3] sm:$0xff] %vm320_vm1, %v362_v11  ;;  %368 = vperm.xlu0 %709, %v362_v11  }
 0x137   : > { %v364_v19 = vmul.f32 1.442695, %v363_v12 }
 0x1a7   : > { %v369_v14 = vpop.permute.xlu0 %368 }
 0x1a8   : > { %v371_v15 = vsub.f32 %v354_v5, %v369_v14 }
 0x1aa   : > { %v372_v16 = vmul.f32 1.442695, %v371_v15 }
 0x1ac   : > { %712 = vpow2.f32 %v372_v16 }
 0x1ad   : > { %714 = vpow2.f32 %v364_v19 }
 0x1b2   : > { %v713_v17 = vpop.eup %712 }
 0x1b3   : > { %612 = vmatmul.msk.f32.vlgmr.msra.gmra.mxu1 %vm358_vm2, %v713_v17  ;;  %v376_v18 = vsel %vm358_vm2, %v713_v17, 0.0  ;;  %v715_v20 = vpop.eup %714 }
 0x1b4   : > { %377 = vadd.xlane.f32.xlu1 %v376_v18  ;;  %v375_v22 = vmul.f32 %v715_v20, %v374_v21 }
 0x1cd   : > { %385 = vperm.xlu1 %710, %v715_v20  }
 0x227   : > { %v378_v23 = vpop.xlane.xlu1 %377 }
 0x228   : > { %v379_v24 = vadd.f32 %v378_v23, %v375_v22 }
 0x22a   : > { %381 = vst.msk [vmem:[#allocation4] sm:$0xff] %vm320_vm1, %v379_v24 }
 0x230   : > { %v410_v30 = vpop.f32.mrf.mxu1 }
 0x231   : > { %v419_v25 = vld [vmem:[#allocation4] sm:$0xff] }
 0x232   : > { %716 = vrcp.f32 %v419_v25 }
 0x238   : > { %v717_v26 = vpop.eup %716 }
 0x239   : > { %424 = vperm.xlu2 %711, %v717_v26  }
 0x23f   : > { %v386_v28 = vpop.permute.xlu1 %385 }
 0x240   : > { %v388_v29 = vmul.f32 %v386_v28, %v382_v27 }
 0x242   : > { %v413_v31 = vadd.f32 %v410_v30, %v388_v29 }
 0x244   : > { %414 = vst.msk [vmem:[#allocation5] sm:$0xff] %vm323_vm0, %v413_v31 }
 0x24b   : > { %v421_v32 = vld [vmem:[#allocation5] sm:$0xff] }
 0x293   : > { %v425_v33 = vpop.permute.xlu2 %424 }
 0x294   : > { %v427_v34 = vmul.f32 %v425_v33, %v421_v32 }
 0x296   : > { %428 = vst.msk [vmem:[%s315_s25] sm:$0xff] %vm323_vm0, %v427_v34 }
 0x297   : > { %835 = shalt.err (!%p832_p11)
}
 0x298   : > { %624 = dma.vmem_to_hbm [thread:$0]  (%p1004_p9), %s446_s29, 128, %s448_s22, %s430_s30  }
 0x299 PF: > { %p641_p13 = scmp.ge.s32.totalorder %s910_s19, 2  ;;  %s459_s7 = sand.u32 1, %s882_s12  }
 0x29a   : > { %s460_s1 = scalar_lea.sflag [#allocation8], %s459_s7 }
 0x29b   : > { %p637_p0 = pnand %p641_p13, %p1010_p12 }
 0x29d   : > { %p638_p1 = pneg %p637_p0 }
 0x29f   : > { %877 = dma.done.wait (%p638_p1), %s460_s1, 128  }
 0x2a0   : > { %879 = vsyncadd (%p638_p1), %s460_s1, 4294967168  ;;  %s22_s19 = sadd.s32 1, %s910_s19   ;;  %s1154_s14 = sld [smem:[#allocation16_spill]] }
 0x2a1   : > { %p19_p2 = scmp.ge.s32.totalorder %s22_s19, 6   ;;  %s1155_s17 = sld [smem:[#allocation22_spill]] }
 0x2a2   : > { %s1156_s15 = sld [smem:[#allocation17_spill]]  ;;  %s1160_s12 = smov %s886_s13 }
 0x2a3   : > { %s1157_s16 = sld [smem:[#allocation18_spill]] }
 0x2a4   : > { %s1158_s28 = sld [smem:[#allocation19_spill]] }
 0x2a5   : > { %s1159_s18 = sld [smem:[#allocation20_spill]] }
 0x2a6   : > { %s1161_s13 = smov %s1154_s14  ;;  %21 = sbr.rel (!%p19_p2) target bundleno = 11 (0xb), region = 109 }
 0x2a7   : > { %s1162_s14 = smov %s1155_s17 }
 0x2aa   : > { %s1163_s17 = smov %s1158_s28 }
 0x2ab   :  { %466 = vsyncpa [#allocation7], 1 }
 0x2ac   :  { %468 = vsyncpa [#allocation7 + $0x1], 1 }
 0x2ad   :  { %469 = vsyncpa [#allocation10], 1 }
 0x2ae   :  { %471 = vsyncpa [#allocation10 + $0x1], 1 }
 0x2af   :  { %472 = vsyncpa [#allocation8], 1 }
 0x2b0   :  { %474 = vsyncpa [#allocation8 + $0x1], 1 }

</bundles_post_ra>
